<compile_context>
chip_gen: v7x
topology: tpu7x:2x2x1
jax: 0.10.0
libtpu: 0.0.40
codegen_flags: <defaults>
</compile_context>

<pallas_src>
import functools

import jax
import jax.numpy as jnp
from jax import lax
from jax.experimental import pallas as pl
from jax.experimental.pallas import tpu as pltpu

# ---- module hyper-params (reference config: embed_dim=512, num_heads=16) ---
FP_SCALE = 2 ** 8       # fixed-point scale (same as torch reference)
QMIN = -2.0 ** 15
QMAX = 2.0 ** 15 - 1.0


def _fixed_point_quantize(t, scale):
    """round(t*scale).clamp(-2^15, 2^15-1) * (1/scale).

    jnp.round and torch.round both round-half-to-even; scale is a power of
    two, so multiplying by the reciprocal is bit-exact vs dividing."""
    inv_scale = 1.0 / scale
    return jnp.clip(jnp.round(t * scale), QMIN, QMAX) * inv_scale


def _head_kernel(x_ref, wq_ref, wk_ref, wv_ref,
                 bq_ref, bk_ref, bv_ref,
                 wo_ref, bo_ref,
                 o_ref, acc_ref, *, fp_scale):
    # Grid = (batch, head).  One head of one batch element per step.
    #   x_ref:  (1, S, E)   resident across the head axis (index map reuses it)
    #   wq/wk/wv_ref: (1, E, D)   per-head projection weights
    #   bq/bk/bv_ref: (1, 1, D)   per-head projection biases
    #   wo_ref: (1, D, E)   per-head slice of the output projection
    #   bo_ref: (1, E)
    #   o_ref:  (1, S, E)   same block for every head of a batch element
    #   acc_ref:(S, E) f32  accumulator across heads
    h = pl.program_id(1)
    last_h = pl.num_programs(1) - 1

    x = x_ref[0]                                   # (S, E)
    wq = wq_ref[0]                                 # (E, D)
    wk = wk_ref[0]
    wv = wv_ref[0]
    D = wq.shape[-1]
    inv_sqrt_d = 1.0 / (float(D) ** 0.5)

    # per-head qkv projection + fixed-point quantize (elementwise quantize of
    # each head's columns == quantizing the full qkv output, as in torch).
    q = _fixed_point_quantize(
        jnp.dot(x, wq, preferred_element_type=jnp.float32) + bq_ref[0], fp_scale)
    k = _fixed_point_quantize(
        jnp.dot(x, wk, preferred_element_type=jnp.float32) + bk_ref[0], fp_scale)
    v = _fixed_point_quantize(
        jnp.dot(x, wv, preferred_element_type=jnp.float32) + bv_ref[0], fp_scale)

    # fold 1/sqrt(D) into q: S*D multiplies instead of S*S on the scores.
    q = q * inv_sqrt_d

    # scores = q @ k^T via dot_general contracting the last dims (no explicit
    # transpose of k is materialized).
    scores = lax.dot_general(q, k, (((1,), (1,)), ((), ())),
                             preferred_element_type=jnp.float32)   # (S, S)

    # softmax over the last axis.
    m = jnp.max(scores, axis=-1, keepdims=True)
    e = jnp.exp(scores - m)
    # NOTE: exact division kept on purpose — pl.reciprocal(approx=True) runs
    # on the EUP slot but its relative error can flip round-half-to-even
    # buckets of the subsequent fixed-point quantize vs the f32 reference.
    p = e / jnp.sum(e, axis=-1, keepdims=True)
    p = _fixed_point_quantize(p, fp_scale)

    ctx = jnp.dot(p, v, preferred_element_type=jnp.float32)         # (S, D)

    @pl.when(h == 0)
    def _():
        acc_ref[...] = jnp.zeros_like(acc_ref)

    # accumulate the output projection per head: lane-dense N = E, no concat.
    acc_ref[...] += jnp.dot(ctx, wo_ref[0], preferred_element_type=jnp.float32)

    @pl.when(h == last_h)
    def _():
        o_ref[0] = _fixed_point_quantize(acc_ref[...] + bo_ref[0], fp_scale)


def fixed_point_attention(x, w_qkv, b_qkv, w_out, b_out,
                          *, num_heads, fp_scale=FP_SCALE):
    """x: [B, S, E] f32.  w_qkv: [E, 3E], b_qkv: [1, 3E], w_out: [E, E],
    b_out: [1, E]  (weights stored [in, out], i.e. torch weight transposed)."""
    B, S, E = x.shape
    H = num_heads
    assert E % H == 0
    D = E // H

    # Pre-split the parameters per head (plain XLA, outside the kernel; in a
    # real model this is done once at weight-load time).
    wq = w_qkv[:, 0 * E:1 * E].reshape(E, H, D).transpose(1, 0, 2)   # (H, E, D)
    wk = w_qkv[:, 1 * E:2 * E].reshape(E, H, D).transpose(1, 0, 2)
    wv = w_qkv[:, 2 * E:3 * E].reshape(E, H, D).transpose(1, 0, 2)
    bq = b_qkv[0, 0 * E:1 * E].reshape(H, 1, D)                      # (H, 1, D)
    bk = b_qkv[0, 1 * E:2 * E].reshape(H, 1, D)
    bv = b_qkv[0, 2 * E:3 * E].reshape(H, 1, D)
    wo = w_out.reshape(H, D, E)                                      # (H, D, E)

    kernel = functools.partial(_head_kernel, fp_scale=fp_scale)

    return pl.pallas_call(
        kernel,
        out_shape=jax.ShapeDtypeStruct((B, S, E), x.dtype),
        grid_spec=pltpu.PrefetchScalarGridSpec(
            num_scalar_prefetch=0,
            grid=(B, H),
            in_specs=[
                pl.BlockSpec((1, S, E), lambda b, h: (b, 0, 0)),   # x (reused over h)
                pl.BlockSpec((1, E, D), lambda b, h: (h, 0, 0)),   # wq
                pl.BlockSpec((1, E, D), lambda b, h: (h, 0, 0)),   # wk
                pl.BlockSpec((1, E, D), lambda b, h: (h, 0, 0)),   # wv
                pl.BlockSpec((1, 1, D), lambda b, h: (h, 0, 0)),   # bq
                pl.BlockSpec((1, 1, D), lambda b, h: (h, 0, 0)),   # bk
                pl.BlockSpec((1, 1, D), lambda b, h: (h, 0, 0)),   # bv
                pl.BlockSpec((1, D, E), lambda b, h: (h, 0, 0)),   # wo
                pl.BlockSpec((1, E), lambda b, h: (0, 0)),         # b_out
            ],
            out_specs=pl.BlockSpec((1, S, E), lambda b, h: (b, 0, 0)),
            scratch_shapes=[pltpu.VMEM((S, E), jnp.float32)],
        ),
        compiler_params=pltpu.CompilerParams(
            # batch axis shards across TensorCores; head axis is the
            # accumulation (output-resident) axis.
            dimension_semantics=("parallel", "arbitrary")),
    )(x, wq, wk, wv, bq, bk, bv, wo, b_out)


def fixed_point_attention_ref(x, w_qkv, b_qkv, w_out, b_out,
                              *, num_heads, fp_scale=FP_SCALE):
    """Pure-JAX reference mirroring the torch forward."""
    B, S, E = x.shape
    D = E // num_heads
    qkv = _fixed_point_quantize(x @ w_qkv + b_qkv[0], fp_scale)
    q, k, v = jnp.split(qkv, 3, axis=-1)
    q = q.reshape(B, S, num_heads, D).transpose(0, 2, 1, 3)
    k = k.reshape(B, S, num_heads, D).transpose(0, 2, 1, 3)
    v = v.reshape(B, S, num_heads, D).transpose(0, 2, 1, 3)
    scores = jnp.einsum('bhqd,bhkd->bhqk', q, k) / (D ** 0.5)
    p = jax.nn.softmax(scores, axis=-1)
    p = _fixed_point_quantize(p, fp_scale)
    ctx = jnp.einsum('bhqk,bhkd->bhqd', p, v)
    ctx = ctx.transpose(0, 2, 1, 3).reshape(B, S, E)
    return _fixed_point_quantize(ctx @ w_out + b_out[0], fp_scale)


if __name__ == "__main__":
    # Small demo shapes, but lane-dense: E = 128 (multiple of 128), and the
    # per-head dim D = 32 matches the reference config (512 / 16).
    B, S, E, H = 2, 8, 128, 4

    key = jax.random.PRNGKey(0)
    kx, kwq, kbq, kwo, kbo = jax.random.split(key, 5)

    x = jax.random.normal(kx, (B, S, E), dtype=jnp.float32)
    bound = 1.0 / (E ** 0.5)
    w_qkv = jax.random.uniform(kwq, (E, 3 * E), jnp.float32, -bound, bound)
    b_qkv = jax.random.uniform(kbq, (1, 3 * E), jnp.float32, -bound, bound)
    w_out = jax.random.uniform(kwo, (E, E), jnp.float32, -bound, bound)
    b_out = jax.random.uniform(kbo, (1, E), jnp.float32, -bound, bound)

    out = fixed_point_attention(x, w_qkv, b_qkv, w_out, b_out, num_heads=H)
    out = jax.block_until_ready(out)

    ref = fixed_point_attention_ref(x, w_qkv, b_qkv, w_out, b_out, num_heads=H)
    assert out.shape == (B, S, E)

    # Both results lie on a 1/FP_SCALE grid.  Benign f32 re-association
    # (per-head accumulation of the output projection, 1/sqrt(D) folded into
    # q) can flip isolated values by one quantization step vs the
    # single-matmul reference; everything else must match exactly.
    diff = jnp.abs(out - ref)
    max_diff = float(jnp.max(diff))
    exact_frac = float(jnp.mean((diff < 1e-6).astype(jnp.float32)))
    assert max_diff <= 2.0 / FP_SCALE + 1e-6, f"max diff {max_diff}"
    assert exact_frac >= 0.99, f"exact-match fraction {exact_frac}"

    print("KERNEL_OK")
</pallas_src>

<mosaic_0001>
module attributes {stable_mosaic.version = 11 : i64} {
  func.func @_head_kernel(%arg0: i32, %arg1: i32, %arg2: memref<1x8x128xf32, #tpu.memory_space<vmem>>, %arg3: memref<1x128x32xf32, #tpu.memory_space<vmem>>, %arg4: memref<1x128x32xf32, #tpu.memory_space<vmem>>, %arg5: memref<1x128x32xf32, #tpu.memory_space<vmem>>, %arg6: memref<1x1x32xf32, #tpu.memory_space<vmem>>, %arg7: memref<1x1x32xf32, #tpu.memory_space<vmem>>, %arg8: memref<1x1x32xf32, #tpu.memory_space<vmem>>, %arg9: memref<1x32x128xf32, #tpu.memory_space<vmem>>, %arg10: memref<1x128xf32, #tpu.memory_space<vmem>>, %arg11: memref<1x8x128xf32, #tpu.memory_space<vmem>>, %arg12: memref<8x128xf32, #tpu.memory_space<vmem>>) attributes {dimension_semantics = [#tpu.dimension_semantics<parallel>, #tpu.dimension_semantics<arbitrary>], iteration_bounds = array<i64: 2, 4>, scalar_prefetch = 0 : i64, scratch_operands = 1 : i64, tpu.core_type = #tpu.core_type<tc>, window_params = [{transform_indices = @transform_0, window_bounds = array<i64: 1, 8, 128>}, {transform_indices = @transform_1, window_bounds = array<i64: 1, 128, 32>}, {transform_indices = @transform_2, window_bounds = array<i64: 1, 128, 32>}, {transform_indices = @transform_3, window_bounds = array<i64: 1, 128, 32>}, {transform_indices = @transform_4, window_bounds = array<i64: 1, 1, 32>}, {transform_indices = @transform_5, window_bounds = array<i64: 1, 1, 32>}, {transform_indices = @transform_6, window_bounds = array<i64: 1, 1, 32>}, {transform_indices = @transform_7, window_bounds = array<i64: 1, 32, 128>}, {pipeline_mode = #tpu.pipeline_mode<synchronous>, transform_indices = @transform_8, window_bounds = array<i64: 1, 128>}, {transform_indices = @transform_9, window_bounds = array<i64: 1, 8, 128>}]} {
    %c0 = arith.constant 0 : index
    %c0_0 = arith.constant 0 : index
    %c0_1 = arith.constant 0 : index
    %0 = vector.load %arg2[%c0, %c0_0, %c0_1] : memref<1x8x128xf32, #tpu.memory_space<vmem>>, vector<1x8x128xf32>
    %1 = vector.shape_cast %0 : vector<1x8x128xf32> to vector<8x128xf32>
    %c0_2 = arith.constant 0 : index
    %c0_3 = arith.constant 0 : index
    %c0_4 = arith.constant 0 : index
    %2 = vector.load %arg3[%c0_2, %c0_3, %c0_4] : memref<1x128x32xf32, #tpu.memory_space<vmem>>, vector<1x128x32xf32>
    %3 = vector.shape_cast %2 : vector<1x128x32xf32> to vector<128x32xf32>
    %c0_5 = arith.constant 0 : index
    %c0_6 = arith.constant 0 : index
    %c0_7 = arith.constant 0 : index
    %4 = vector.load %arg4[%c0_5, %c0_6, %c0_7] : memref<1x128x32xf32, #tpu.memory_space<vmem>>, vector<1x128x32xf32>
    %5 = vector.shape_cast %4 : vector<1x128x32xf32> to vector<128x32xf32>
    %c0_8 = arith.constant 0 : index
    %c0_9 = arith.constant 0 : index
    %c0_10 = arith.constant 0 : index
    %6 = vector.load %arg5[%c0_8, %c0_9, %c0_10] : memref<1x128x32xf32, #tpu.memory_space<vmem>>, vector<1x128x32xf32>
    %7 = vector.shape_cast %6 : vector<1x128x32xf32> to vector<128x32xf32>
    %cst = arith.constant dense<0.000000e+00> : vector<8x32xf32>
    %8 = tpu.matmul %1, %3, %cst {dimension_numbers = #tpu.dot_dimension_numbers<[1], [0], [0], [1], [0, 0, 1, 1], [], []>} : vector<8x128xf32>, vector<128x32xf32>, vector<8x32xf32> -> vector<8x32xf32>
    %c0_11 = arith.constant 0 : index
    %c0_12 = arith.constant 0 : index
    %c0_13 = arith.constant 0 : index
    %9 = vector.load %arg6[%c0_11, %c0_12, %c0_13] : memref<1x1x32xf32, #tpu.memory_space<vmem>>, vector<1x1x32xf32>
    %10 = vector.shape_cast %9 : vector<1x1x32xf32> to vector<1x32xf32>
    %11 = vector.broadcast %10 : vector<1x32xf32> to vector<8x32xf32>
    %12 = arith.addf %8, %11 : vector<8x32xf32>
    %cst_14 = arith.constant 2.560000e+02 : f32
    %13 = vector.broadcast %cst_14 : f32 to vector<8x32xf32>
    %14 = arith.mulf %12, %13 : vector<8x32xf32>
    %15 = math.roundeven %14 : vector<8x32xf32>
    %cst_15 = arith.constant -3.276800e+04 : f32
    %cst_16 = arith.constant 3.276700e+04 : f32
    %16 = vector.broadcast %cst_15 : f32 to vector<8x32xf32>
    %17 = arith.maximumf %16, %15 : vector<8x32xf32>
    %18 = vector.broadcast %cst_16 : f32 to vector<8x32xf32>
    %19 = arith.minimumf %18, %17 : vector<8x32xf32>
    %cst_17 = arith.constant 3.906250e-03 : f32
    %20 = vector.broadcast %cst_17 : f32 to vector<8x32xf32>
    %21 = arith.mulf %19, %20 : vector<8x32xf32>
    %cst_18 = arith.constant dense<0.000000e+00> : vector<8x32xf32>
    %22 = tpu.matmul %1, %5, %cst_18 {dimension_numbers = #tpu.dot_dimension_numbers<[1], [0], [0], [1], [0, 0, 1, 1], [], []>} : vector<8x128xf32>, vector<128x32xf32>, vector<8x32xf32> -> vector<8x32xf32>
    %c0_19 = arith.constant 0 : index
    %c0_20 = arith.constant 0 : index
    %c0_21 = arith.constant 0 : index
    %23 = vector.load %arg7[%c0_19, %c0_20, %c0_21] : memref<1x1x32xf32, #tpu.memory_space<vmem>>, vector<1x1x32xf32>
    %24 = vector.shape_cast %23 : vector<1x1x32xf32> to vector<1x32xf32>
    %25 = vector.broadcast %24 : vector<1x32xf32> to vector<8x32xf32>
    %26 = arith.addf %22, %25 : vector<8x32xf32>
    %cst_22 = arith.constant 2.560000e+02 : f32
    %27 = vector.broadcast %cst_22 : f32 to vector<8x32xf32>
    %28 = arith.mulf %26, %27 : vector<8x32xf32>
    %29 = math.roundeven %28 : vector<8x32xf32>
    %cst_23 = arith.constant -3.276800e+04 : f32
    %cst_24 = arith.constant 3.276700e+04 : f32
    %30 = vector.broadcast %cst_23 : f32 to vector<8x32xf32>
    %31 = arith.maximumf %30, %29 : vector<8x32xf32>
    %32 = vector.broadcast %cst_24 : f32 to vector<8x32xf32>
    %33 = arith.minimumf %32, %31 : vector<8x32xf32>
    %cst_25 = arith.constant 3.906250e-03 : f32
    %34 = vector.broadcast %cst_25 : f32 to vector<8x32xf32>
    %35 = arith.mulf %33, %34 : vector<8x32xf32>
    %cst_26 = arith.constant dense<0.000000e+00> : vector<8x32xf32>
    %36 = tpu.matmul %1, %7, %cst_26 {dimension_numbers = #tpu.dot_dimension_numbers<[1], [0], [0], [1], [0, 0, 1, 1], [], []>} : vector<8x128xf32>, vector<128x32xf32>, vector<8x32xf32> -> vector<8x32xf32>
    %c0_27 = arith.constant 0 : index
    %c0_28 = arith.constant 0 : index
    %c0_29 = arith.constant 0 : index
    %37 = vector.load %arg8[%c0_27, %c0_28, %c0_29] : memref<1x1x32xf32, #tpu.memory_space<vmem>>, vector<1x1x32xf32>
    %38 = vector.shape_cast %37 : vector<1x1x32xf32> to vector<1x32xf32>
    %39 = vector.broadcast %38 : vector<1x32xf32> to vector<8x32xf32>
    %40 = arith.addf %36, %39 : vector<8x32xf32>
    %cst_30 = arith.constant 2.560000e+02 : f32
    %41 = vector.broadcast %cst_30 : f32 to vector<8x32xf32>
    %42 = arith.mulf %40, %41 : vector<8x32xf32>
    %43 = math.roundeven %42 : vector<8x32xf32>
    %cst_31 = arith.constant -3.276800e+04 : f32
    %cst_32 = arith.constant 3.276700e+04 : f32
    %44 = vector.broadcast %cst_31 : f32 to vector<8x32xf32>
    %45 = arith.maximumf %44, %43 : vector<8x32xf32>
    %46 = vector.broadcast %cst_32 : f32 to vector<8x32xf32>
    %47 = arith.minimumf %46, %45 : vector<8x32xf32>
    %cst_33 = arith.constant 3.906250e-03 : f32
    %48 = vector.broadcast %cst_33 : f32 to vector<8x32xf32>
    %49 = arith.mulf %47, %48 : vector<8x32xf32>
    %cst_34 = arith.constant 0.176776692 : f32
    %50 = vector.broadcast %cst_34 : f32 to vector<8x32xf32>
    %51 = arith.mulf %21, %50 : vector<8x32xf32>
    %cst_35 = arith.constant dense<0.000000e+00> : vector<8x8xf32>
    %52 = tpu.matmul %51, %35, %cst_35 {dimension_numbers = #tpu.dot_dimension_numbers<[1], [1], [0], [0], [0, 0, 1, 0], [], []>} : vector<8x32xf32>, vector<8x32xf32>, vector<8x8xf32> -> vector<8x8xf32>
    %cst_36 = arith.constant dense<0xFF800000> : vector<8xf32>
    %53 = vector.multi_reduction <maximumf>, %52, %cst_36 [1] : vector<8x8xf32> to vector<8xf32>
    %54 = vector.shape_cast %53 : vector<8xf32> to vector<8x1xf32>
    %55 = vector.broadcast %54 : vector<8x1xf32> to vector<8x8xf32>
    %56 = arith.subf %52, %55 : vector<8x8xf32>
    %57 = math.exp %56 : vector<8x8xf32>
    %cst_37 = arith.constant dense<0.000000e+00> : vector<8xf32>
    %58 = vector.multi_reduction <add>, %57, %cst_37 [1] : vector<8x8xf32> to vector<8xf32>
    %59 = vector.shape_cast %58 : vector<8xf32> to vector<8x1xf32>
    %60 = vector.broadcast %59 : vector<8x1xf32> to vector<8x8xf32>
    %61 = arith.divf %57, %60 : vector<8x8xf32>
    %cst_38 = arith.constant 2.560000e+02 : f32
    %62 = vector.broadcast %cst_38 : f32 to vector<8x8xf32>
    %63 = arith.mulf %61, %62 : vector<8x8xf32>
    %64 = math.roundeven %63 : vector<8x8xf32>
    %cst_39 = arith.constant -3.276800e+04 : f32
    %cst_40 = arith.constant 3.276700e+04 : f32
    %65 = vector.broadcast %cst_39 : f32 to vector<8x8xf32>
    %66 = arith.maximumf %65, %64 : vector<8x8xf32>
    %67 = vector.broadcast %cst_40 : f32 to vector<8x8xf32>
    %68 = arith.minimumf %67, %66 : vector<8x8xf32>
    %cst_41 = arith.constant 3.906250e-03 : f32
    %69 = vector.broadcast %cst_41 : f32 to vector<8x8xf32>
    %70 = arith.mulf %68, %69 : vector<8x8xf32>
    %cst_42 = arith.constant dense<0.000000e+00> : vector<8x32xf32>
    %71 = tpu.matmul %70, %49, %cst_42 {dimension_numbers = #tpu.dot_dimension_numbers<[1], [0], [0], [1], [0, 0, 1, 1], [], []>} : vector<8x8xf32>, vector<8x32xf32>, vector<8x32xf32> -> vector<8x32xf32>
    %c0_i32 = arith.constant 0 : i32
    %72 = arith.cmpi eq, %arg1, %c0_i32 : i32
    %73 = arith.extui %72 : i1 to i32
    %c0_i32_43 = arith.constant 0 : i32
    %74 = arith.cmpi ne, %73, %c0_i32_43 : i32
    scf.if %74 {
      %cst_53 = arith.constant 0.000000e+00 : f32
      %84 = vector.broadcast %cst_53 : f32 to vector<8x128xf32>
      %c0_54 = arith.constant 0 : index
      %c0_55 = arith.constant 0 : index
      %85 = vector.load %arg12[%c0_54, %c0_55] : memref<8x128xf32, #tpu.memory_space<vmem>>, vector<8x128xf32>
      tpu.vector_store %arg12[%c0_54, %c0_55], %84 {strides = array<i32>} : memref<8x128xf32, #tpu.memory_space<vmem>>, vector<8x128xf32>,
    } else {
    }
    %c0_44 = arith.constant 0 : index
    %c0_45 = arith.constant 0 : index
    %75 = vector.load %arg12[%c0_44, %c0_45] : memref<8x128xf32, #tpu.memory_space<vmem>>, vector<8x128xf32>
    %c0_46 = arith.constant 0 : index
    %c0_47 = arith.constant 0 : index
    %c0_48 = arith.constant 0 : index
    %76 = vector.load %arg9[%c0_46, %c0_47, %c0_48] : memref<1x32x128xf32, #tpu.memory_space<vmem>>, vector<1x32x128xf32>
    %77 = vector.shape_cast %76 : vector<1x32x128xf32> to vector<32x128xf32>
    %cst_49 = arith.constant dense<0.000000e+00> : vector<8x128xf32>
    %78 = tpu.matmul %71, %77, %cst_49 {dimension_numbers = #tpu.dot_dimension_numbers<[1], [0], [0], [1], [0, 0, 1, 1], [], []>} : vector<8x32xf32>, vector<32x128xf32>, vector<8x128xf32> -> vector<8x128xf32>
    %79 = arith.addf %75, %78 : vector<8x128xf32>
    %c0_50 = arith.constant 0 : index
    %c0_51 = arith.constant 0 : index
    %80 = vector.load %arg12[%c0_50, %c0_51] : memref<8x128xf32, #tpu.memory_space<vmem>>, vector<8x128xf32>
    tpu.vector_store %arg12[%c0_50, %c0_51], %79 {strides = array<i32>} : memref<8x128xf32, #tpu.memory_space<vmem>>, vector<8x128xf32>,
    %c3_i32 = arith.constant 3 : i32
    %81 = arith.cmpi eq, %arg1, %c3_i32 : i32
    %82 = arith.extui %81 : i1 to i32
    %c0_i32_52 = arith.constant 0 : i32
    %83 = arith.cmpi ne, %82, %c0_i32_52 : i32
    scf.if %83 {
      %c0_53 = arith.constant 0 : index
      %c0_54 = arith.constant 0 : index
      %84 = vector.load %arg12[%c0_53, %c0_54] : memref<8x128xf32, #tpu.memory_space<vmem>>, vector<8x128xf32>
      %c0_55 = arith.constant 0 : index
      %c0_56 = arith.constant 0 : index
      %85 = vector.load %arg10[%c0_55, %c0_56] : memref<1x128xf32, #tpu.memory_space<vmem>>, vector<1x128xf32>
      %86 = vector.shape_cast %85 : vector<1x128xf32> to vector<128xf32>
      %87 = vector.shape_cast %86 : vector<128xf32> to vector<1x128xf32>
      %88 = vector.broadcast %87 : vector<1x128xf32> to vector<8x128xf32>
      %89 = arith.addf %84, %88 : vector<8x128xf32>
      %cst_57 = arith.constant 2.560000e+02 : f32
      %90 = vector.broadcast %cst_57 : f32 to vector<8x128xf32>
      %91 = arith.mulf %89, %90 : vector<8x128xf32>
      %92 = math.roundeven %91 : vector<8x128xf32>
      %cst_58 = arith.constant -3.276800e+04 : f32
      %cst_59 = arith.constant 3.276700e+04 : f32
      %93 = vector.broadcast %cst_58 : f32 to vector<8x128xf32>
      %94 = arith.maximumf %93, %92 : vector<8x128xf32>
      %95 = vector.broadcast %cst_59 : f32 to vector<8x128xf32>
      %96 = arith.minimumf %95, %94 : vector<8x128xf32>
      %cst_60 = arith.constant 3.906250e-03 : f32
      %97 = vector.broadcast %cst_60 : f32 to vector<8x128xf32>
      %98 = arith.mulf %96, %97 : vector<8x128xf32>
      %c0_61 = arith.constant 0 : index
      %c0_62 = arith.constant 0 : index
      %c0_63 = arith.constant 0 : index
      %99 = vector.load %arg11[%c0_61, %c0_62, %c0_63] : memref<1x8x128xf32, #tpu.memory_space<vmem>>, vector<1x8x128xf32>
      %100 = vector.shape_cast %99 : vector<1x8x128xf32> to vector<8x128xf32>
      %101 = vector.shape_cast %98 : vector<8x128xf32> to vector<1x8x128xf32>
      tpu.vector_store %arg11[%c0_61, %c0_62, %c0_63], %101 {strides = array<i32>} : memref<1x8x128xf32, #tpu.memory_space<vmem>>, vector<1x8x128xf32>,
    } else {
    }
    return
  }
  func.func @transform_0(%arg0: i32, %arg1: i32) -> (i32, i32, i32) {
    %c0_i32 = arith.constant 0 : i32
    %c0_i32_0 = arith.constant 0 : i32
    %c0_i32_1 = arith.constant 0 : i32
    return %arg0, %c0_i32, %c0_i32_0 : i32, i32, i32
  }
  func.func @transform_1(%arg0: i32, %arg1: i32) -> (i32, i32, i32) {
    %c0_i32 = arith.constant 0 : i32
    %c0_i32_0 = arith.constant 0 : i32
    %c0_i32_1 = arith.constant 0 : i32
    return %arg1, %c0_i32, %c0_i32_0 : i32, i32, i32
  }
  func.func @transform_2(%arg0: i32, %arg1: i32) -> (i32, i32, i32) {
    %c0_i32 = arith.constant 0 : i32
    %c0_i32_0 = arith.constant 0 : i32
    %c0_i32_1 = arith.constant 0 : i32
    return %arg1, %c0_i32, %c0_i32_0 : i32, i32, i32
  }
  func.func @transform_3(%arg0: i32, %arg1: i32) -> (i32, i32, i32) {
    %c0_i32 = arith.constant 0 : i32
    %c0_i32_0 = arith.constant 0 : i32
    %c0_i32_1 = arith.constant 0 : i32
    return %arg1, %c0_i32, %c0_i32_0 : i32, i32, i32
  }
  func.func @transform_4(%arg0: i32, %arg1: i32) -> (i32, i32, i32) {
    %c0_i32 = arith.constant 0 : i32
    %c0_i32_0 = arith.constant 0 : i32
    %c0_i32_1 = arith.constant 0 : i32
    return %arg1, %c0_i32, %c0_i32_0 : i32, i32, i32
  }
  func.func @transform_5(%arg0: i32, %arg1: i32) -> (i32, i32, i32) {
    %c0_i32 = arith.constant 0 : i32
    %c0_i32_0 = arith.constant 0 : i32
    %c0_i32_1 = arith.constant 0 : i32
    return %arg1, %c0_i32, %c0_i32_0 : i32, i32, i32
  }
  func.func @transform_6(%arg0: i32, %arg1: i32) -> (i32, i32, i32) {
    %c0_i32 = arith.constant 0 : i32
    %c0_i32_0 = arith.constant 0 : i32
    %c0_i32_1 = arith.constant 0 : i32
    return %arg1, %c0_i32, %c0_i32_0 : i32, i32, i32
  }
  func.func @transform_7(%arg0: i32, %arg1: i32) -> (i32, i32, i32) {
    %c0_i32 = arith.constant 0 : i32
    %c0_i32_0 = arith.constant 0 : i32
    %c0_i32_1 = arith.constant 0 : i32
    return %arg1, %c0_i32, %c0_i32_0 : i32, i32, i32
  }
  func.func @transform_8(%arg0: i32, %arg1: i32) -> (i32, i32) {
    %c0_i32 = arith.constant 0 : i32
    %c0_i32_0 = arith.constant 0 : i32
    %c0_i32_1 = arith.constant 0 : i32
    return %c0_i32, %c0_i32_0 : i32, i32
  }
  func.func @transform_9(%arg0: i32, %arg1: i32) -> (i32, i32, i32) {
    %c0_i32 = arith.constant 0 : i32
    %c0_i32_0 = arith.constant 0 : i32
    %c0_i32_1 = arith.constant 0 : i32
    return %arg0, %c0_i32, %c0_i32_0 : i32, i32, i32
  }
}

</mosaic_0001>

<bundles_post_ra>
// kernel: tpu_custom_call.1
= control target key start
LH: loop header
LB: loop body
LE: loop exit
PB: predicated region body
PF: predicated region fallthrough
CT: control target
= control target key end

     0   :  { %14 = vsyncpa [#allocation4], 0  ;;  %s2008_s0 = inlined_call_operand.vmem [shape: f32[2,8,128], index: 0, kind: input, shape index: {}]   ;;  %s2009_s1 = inlined_call_operand.vmem [shape: f32[4,128,32], index: 1, kind: input, shape index: {}]   ;;  %s2010_s2 = inlined_call_operand.vmem [shape: f32[4,128,32], index: 2, kind: input, shape index: {}]   ;;  %s2011_s3 = inlined_call_operand.vmem [shape: f32[4,128,32], index: 3, kind: input, shape index: {}]   ;;  %s2012_s4 = inlined_call_operand.vmem [shape: f32[4,1,32], index: 4, kind: input, shape index: {}]   ;;  %s2013_s5 = inlined_call_operand.vmem [shape: f32[4,1,32], index: 5, kind: input, shape index: {}]   ;;  %s2014_s6 = inlined_call_operand.vmem [shape: f32[4,1,32], index: 6, kind: input, shape index: {}]   ;;  %s2015_s7 = inlined_call_operand.vmem [shape: f32[4,32,128], index: 7, kind: input, shape index: {}]   ;;  %s2016_s8 = inlined_call_operand.vmem [shape: f32[1,128], index: 8, kind: input, shape index: {}]   ;;  %s2017_s9 = inlined_call_operand.hbm [shape: f32[2,8,128], index: 9, kind: output, shape index: {}]  }
   0x1   :  { %16 = vsyncpa [#allocation4 + $0x1], 0  ;;  %s1720_s30 = smov 0   ;;  %s1722_s10 = smov 0  }
   0x2   :  { %s1724_s11 = smov 0   ;;  %s1726_s12 = smov 0  }
   0x3   :  { %s1728_s13 = smov 0   ;;  %s1730_s14 = smov 0  }
   0x4   :  { %s1732_s15 = smov 0   ;;  %s1734_s16 = smov 0  }
   0x5 LB: > { %2022 = sst [smem:[#allocation6_spill]] %s1655_s14  ;;  %s1188_s17 = sadd.s32 4294967295, %s1663_s16   ;;  %s1663_s16 = sphi %s1734_s16, %s22_s16   ;;  %s1659_s15 = sphi %s1732_s15, %s2034_s15   ;;  %s1655_s14 = sphi %s1730_s14, %s2033_s14   ;;  %s1651_s13 = sphi %s1728_s13, %s2032_s13   ;;  %s1647_s12 = sphi %s1726_s12, %s2031_s12   ;;  %s1643_s11 = sphi %s1724_s11, %s2037_s11   ;;  %s1639_s10 = sphi %s1722_s10, %s2036_s10   ;;  %s1635_s30 = sphi %s1720_s30, %s2035_s30  }
   0x6   : > { %2023 = sst [smem:[#allocation7_spill]] %s1659_s15  ;;  %s1189_s18 = sadd.s32 4294967294, %s1663_s16  }
   0x7   : > { %s31_s19 = sadd.s32 1, %s1655_s14  ;;  %s34_s20 = sadd.s32 1, %s1659_s15 }
   0x8   : > { %p32_p0 = scmp.ge.s32.totalorder %s31_s19, 4  ;;  %p280_p1 = scmp.ne.s32.totalorder %s1643_s11, %s1639_s10 }
   0x9   : > { %p281_p2 = scmp.eq.s32.totalorder %s1188_s17, 7  ;;  %p286_p4 = scmp.ne.s32.totalorder %s1639_s10, %s1635_s30 }
   0xa   : > { %s2039_s19 = smov (%p32_p0, %s31_s19), 0  ;;  %s2041_s20 = smov (!%p32_p0, %s34_s20), %s1659_s15 }
   0xb   : > { %2024 = sst [smem:[#allocation8_spill]] %s2039_s19  ;;  %p1769_p3 = por %p281_p2, %p280_p1 }
   0xc   : > { %p36_p5 = scmp.ge.s32.totalorder %s2041_s20, 2  ;;  %p287_p6 = scmp.eq.s32.totalorder %s1189_s18, 7 }
   0xd   : > { %p1192_p7 = scmp.ge.s32.totalorder %s1663_s16, 1  ;;  %p365_p8 = scmp.lt.s32.totalorder %s1663_s16, 9 }
   0xe   : > { %s2043_s20 = smov (%p36_p5, %s2041_s20), 0  ;;  %p1779_p9 = por %p287_p6, %p286_p4 }
   0xf   : > { %2026 = sst [smem:[#allocation9_spill]] %s2043_s20  ;;  %p366_p10 = pnand %p1192_p7, %p365_p8 }
  0x10   : > { %s267_s23 = ssub.s32 %s1659_s15, %s2043_s20  ;;  %s270_s24 = sadd.s32 1, %s1643_s11  ;;  %v1665_v0 = vmov (!%p366_p10), 0.0|0.0   ;;  %vm1666_vm0 = vmmov (!%p366_p10), 0   ;;  %v1667_v1 = vmov (!%p366_p10), 0.0   ;;  %vm758_vm1 = vcmask (!%p366_p10), 261120  }
  0x11   : > { %p268_p11 = scmp.eq.s32.totalorder %s267_s23, 0  ;;  %369 = sbr.rel (%p366_p10) target bundleno = 1308 (0x51c), region = 56  ;;  %1431 = vmatprep.subr.bf16.mxu1 (!%p366_p10), %v1665_v0  ;;  %1407 = vmatprep.subr.bf16.mxu0 (!%p366_p10), %v1665_v0  ;;  %vm835_vm2 = vcmask (!%p366_p10), 64512  }
  0x12   : > { %s2018_s26 = sand.u32 (!%p366_p10), 1, %s1639_s10   ;;  %p433_p12 = scmp.lt.s32.totalorder (!%p366_p10), %s1647_s12, 3  ;;  %1348 = vmatprep.mubr.msk.f32.mxu1 (!%p366_p10), %vm1666_vm0, %v1667_v1  ;;  %1313 = vmatprep.mubr.msk.f32.mxu0 (!%p366_p10), %vm1666_vm0, %v1667_v1 }
  0x13   : > { %s1787_s25 = scalar_select %p268_p11, %s1643_s11, %s270_s24  }
  0x14   : > { %s1794_s27 = sshll.u32 (!%p366_p10), %s2018_s26, 3  ;;  %p429_p13 = scmp.lt.s32.totalorder (!%p366_p10), %s1651_s13, 1 }
  0x15   : > { %2028 = sst [smem:[#allocation10_spill]] %s1787_s25  ;;  %p1209_p0 = scmp.ne.s32.totalorder (!%p366_p10), %s1647_s12, 0 }
  0x18   : > { %s1802_s28 = scalar_select %p433_p12, %s1647_s12, 3 }
  0x19   : > { %s430_s14 = scalar_select %p429_p13, %s1651_s13, 1 }
  0x1a   : > { %s1805_s29 = sshll.u32 %s1802_s28, 7  ;;  %s1220_s17 = sshll.u32 %s1802_s28, 5 }
  0x1b   : > { %s1812_s24 = scalar_lea.vmem %s2010_s2, %s1805_s29  ;;  %s1817_s19 = scalar_lea.vmem %s2015_s7, %s1220_s17 }
  0x1c   : > { %v479_v2 = vld [vmem:[%s1812_s24] sm:$0xff]  ;;  %v480_v3 = vld [vmem:[%s1812_s24 + $0x8] sm:$0xff]  ;;  %s1825_s25 = scalar_lea.vmem %s2009_s1, %s1805_s29  ;;  %v481_v4 = vld [vmem:[%s1812_s24 + $0x10] sm:$0xff]  ;;  %s1194_s15 = sshll.u32 %s430_s14, 3 }
  0x1d   : > { %v1432_v5 = vpack.c.bf16 %v480_v3, %v479_v2  ;;  %v463_v6 = vld [vmem:[%s1825_s25] sm:$0xff]  ;;  %v464_v7 = vld [vmem:[%s1825_s25 + $0x8] sm:$0xff]  ;;  %v482_v8 = vld [vmem:[%s1812_s24 + $0x18] sm:$0xff]  ;;  %s432_s17 = scalar_lea.vmem %s2008_s0, %s1194_s15  ;;  %s453_s23 = scalar_lea.vmem %s2013_s5, %s1802_s28 }
  0x1e   : > { %v1408_v9 = vpack.c.bf16 %v464_v7, %v463_v6  ;;  %v465_v10 = vld [vmem:[%s1825_s25 + $0x10] sm:$0xff]  ;;  %v466_v11 = vld [vmem:[%s1825_s25 + $0x18] sm:$0xff]  ;;  %v1435_v12 = vpack.c.bf16 %v482_v8, %v481_v4  ;;  %v483_v14 = vld [vmem:[%s1812_s24 + $0x20] sm:$0xff]  ;;  %s450_s15 = scalar_lea.vmem %s2012_s4, %s1802_s28  ;;  %s456_s18 = scalar_lea.vmem %s2014_s6, %s1802_s28 }
  0x1f   : > { %1433 = vmatpush3.bf16.msra.mxu1 %v1432_v5  ;;  %v1411_v13 = vpack.c.bf16 %v466_v11, %v465_v10  ;;  %v484_v15 = vld [vmem:[%s1812_s24 + $0x28] sm:$0xff]  ;;  %v467_v16 = vld [vmem:[%s1825_s25 + $0x20] sm:$0xff]  ;;  %v485_v20 = vld [vmem:[%s1812_s24 + $0x30] sm:$0xff]  ;;  %s428_s28 = scalar_lea.vmem [#allocation3], %s1794_s27 }
  0x20   : > { %1409 = vmatpush3.bf16.msra.mxu0 %v1408_v9  ;;  %1434 = vmatprep.subr.bf16.mxu1 %v1665_v0  ;;  %v468_v17 = vld [vmem:[%s1825_s25 + $0x28] sm:$0xff]  ;;  %v1438_v18 = vpack.c.bf16 %v484_v15, %v483_v14  ;;  %v486_v21 = vld [vmem:[%s1812_s24 + $0x38] sm:$0xff]  ;;  %v469_v22 = vld [vmem:[%s1825_s25 + $0x30] sm:$0xff] }
  0x21   : > { %1410 = vmatprep.subr.bf16.mxu0 %v1665_v0  ;;  %v1414_v19 = vpack.c.bf16 %v468_v17, %v467_v16  ;;  %v470_v23 = vld [vmem:[%s1825_s25 + $0x38] sm:$0xff]  ;;  %v1441_v24 = vpack.c.bf16 %v486_v21, %v485_v20  ;;  %v487_v26 = vld [vmem:[%s1812_s24 + $0x40] sm:$0xff]  ;;  %v488_v27 = vld [vmem:[%s1812_s24 + $0x48] sm:$0xff] }
  0x22   : > { %v1417_v25 = vpack.c.bf16 %v470_v23, %v469_v22  ;;  %v471_v28 = vld [vmem:[%s1825_s25 + $0x40] sm:$0xff]  ;;  %v472_v29 = vld [vmem:[%s1825_s25 + $0x48] sm:$0xff]  ;;  %v1444_v30 = vpack.c.bf16 %v488_v27, %v487_v26  ;;  %v489_v32 = vld [vmem:[%s1812_s24 + $0x50] sm:$0xff] }
  0x23   : > { %1436 = vmatpush3.bf16.msra.mxu1 %v1435_v12  ;;  %v1420_v31 = vpack.c.bf16 %v472_v29, %v471_v28  ;;  %v490_v33 = vld [vmem:[%s1812_s24 + $0x58] sm:$0xff]  ;;  %v473_v34 = vld [vmem:[%s1825_s25 + $0x50] sm:$0xff]  ;;  %v491_v38 = vld [vmem:[%s1812_s24 + $0x60] sm:$0xff] }
  0x24   : > { %1412 = vmatpush3.bf16.msra.mxu0 %v1411_v13  ;;  %1437 = vmatprep.subr.bf16.mxu1 %v1665_v0  ;;  %v474_v35 = vld [vmem:[%s1825_s25 + $0x58] sm:$0xff]  ;;  %v1447_v36 = vpack.c.bf16 %v490_v33, %v489_v32  ;;  %v492_v39 = vld [vmem:[%s1812_s24 + $0x68] sm:$0xff]  ;;  %v475_v40 = vld [vmem:[%s1825_s25 + $0x60] sm:$0xff] }
  0x25   : > { %1413 = vmatprep.subr.bf16.mxu0 %v1665_v0  ;;  %v1423_v37 = vpack.c.bf16 %v474_v35, %v473_v34  ;;  %v476_v41 = vld [vmem:[%s1825_s25 + $0x68] sm:$0xff]  ;;  %v1450_v42 = vpack.c.bf16 %v492_v39, %v491_v38  ;;  %v493_v44 = vld [vmem:[%s1812_s24 + $0x70] sm:$0xff]  ;;  %v494_v45 = vld [vmem:[%s1812_s24 + $0x78] sm:$0xff] }
  0x26   : > { %v1426_v43 = vpack.c.bf16 %v476_v41, %v475_v40  ;;  %v477_v46 = vld [vmem:[%s1825_s25 + $0x70] sm:$0xff]  ;;  %v478_v47 = vld [vmem:[%s1825_s25 + $0x78] sm:$0xff]  ;;  %v1453_v48 = vpack.c.bf16 %v494_v45, %v493_v44  ;;  %v1876_v50 = vld [vmem:[%s432_s17] sm:$0xff]  ;;  %s1903_s17 = scalar_lea.vmem %s2011_s3, %s1805_s29 }
  0x27   : > { %1439 = vmatpush3.bf16.msra.mxu1 %v1438_v18  ;;  %v1429_v49 = vpack.c.bf16 %v478_v47, %v477_v46  ;;  %v1204_v51 = vld [vmem:[%s453_s23] ss:$0 sm:$0xff]  ;;  %v496_v9 = vld [vmem:[%s1903_s17 + $0x8] sm:$0xff]  ;;  %v497_v10 = vld [vmem:[%s1903_s17 + $0x10] sm:$0xff] }
  0x28   : > { %1415 = vmatpush3.bf16.msra.mxu0 %v1414_v19  ;;  %1440 = vmatprep.subr.bf16.mxu1 %v1665_v0  ;;  %v1203_v52 = vld [vmem:[%s450_s15] ss:$0 sm:$0xff]  ;;  %v498_v12 = vld [vmem:[%s1903_s17 + $0x18] sm:$0xff]  ;;  %v500_v15 = vld [vmem:[%s1903_s17 + $0x28] sm:$0xff] }
  0x29   : > { %1416 = vmatprep.subr.bf16.mxu0 %v1665_v0  ;;  %v495_v8 = vld [vmem:[%s1903_s17] sm:$0xff]  ;;  %v1459_v13 = vpack.c.bf16 %v498_v12, %v497_v10  ;;  %v501_v17 = vld [vmem:[%s1903_s17 + $0x30] sm:$0xff]  ;;  %v502_v18 = vld [vmem:[%s1903_s17 + $0x38] sm:$0xff] }
  0x2a   : > { %v1456_v11 = vpack.c.bf16 %v496_v9, %v495_v8  ;;  %v499_v14 = vld [vmem:[%s1903_s17 + $0x20] sm:$0xff]  ;;  %v1465_v19 = vpack.c.bf16 %v502_v18, %v501_v17  ;;  %v504_v21 = vld [vmem:[%s1903_s17 + $0x48] sm:$0xff]  ;;  %v505_v23 = vld [vmem:[%s1903_s17 + $0x50] sm:$0xff] }
  0x2b   : > { %1442 = vmatpush3.bf16.msra.mxu1 %v1441_v24  ;;  %v1462_v16 = vpack.c.bf16 %v500_v15, %v499_v14  ;;  %v503_v20 = vld [vmem:[%s1903_s17 + $0x40] sm:$0xff]  ;;  %v506_v24 = vld [vmem:[%s1903_s17 + $0x58] sm:$0xff]  ;;  %v508_v27 = vld [vmem:[%s1903_s17 + $0x68] sm:$0xff] }
  0x2c   : > { %1418 = vmatpush3.bf16.msra.mxu0 %v1417_v25  ;;  %1443 = vmatprep.subr.bf16.mxu1 %v1665_v0  ;;  %v1468_v22 = vpack.c.bf16 %v504_v21, %v503_v20  ;;  %v1471_v25 = vpack.c.bf16 %v506_v24, %v505_v23  ;;  %v507_v26 = vld [vmem:[%s1903_s17 + $0x60] sm:$0xff]  ;;  %v509_v29 = vld [vmem:[%s1903_s17 + $0x70] sm:$0xff] }
  0x2d   : > { %1419 = vmatprep.subr.bf16.mxu0 %v1665_v0  ;;  %v1474_v28 = vpack.c.bf16 %v508_v27, %v507_v26  ;;  %v1205_v41 = vld [vmem:[%s456_s18] ss:$0 sm:$0xff] }
  0x2f   : > { %1445 = vmatpush3.bf16.msra.mxu1 %v1444_v30  ;;  %v510_v30 = vld [vmem:[%s1903_s17 + $0x78] sm:$0xff] }
  0x30   : > { %1421 = vmatpush3.bf16.msra.mxu0 %v1420_v31  ;;  %1446 = vmatprep.subr.bf16.mxu1 %v1665_v0  ;;  %v1477_v31 = vpack.c.bf16 %v510_v30, %v509_v29 }
  0x31   : > { %1422 = vmatprep.subr.bf16.mxu0 %v1665_v0 }
  0x33   : > { %1448 = vmatpush3.bf16.msra.mxu1 %v1447_v36 }
  0x34   : > { %1424 = vmatpush3.bf16.msra.mxu0 %v1423_v37  ;;  %1449 = vmatprep.subr.bf16.mxu1 %v1665_v0 }
  0x35   : > { %1425 = vmatprep.subr.bf16.mxu0 %v1665_v0 }
  0x37   : > { %1451 = vmatpush3.bf16.msra.mxu1 %v1450_v42 }
  0x38   : > { %1427 = vmatpush3.bf16.msra.mxu0 %v1426_v43  ;;  %1452 = vmatprep.subr.bf16.mxu1 %v1665_v0 }
  0x39   : > { %1428 = vmatprep.subr.bf16.mxu0 %v1665_v0 }
  0x3b   : > { %1454 = vmatpush3.bf16.msra.mxu1 %v1453_v48 }
  0x3c   : > { %1430 = vmatpush3.bf16.msra.mxu0 %v1429_v49  ;;  %1386 = vmatprep.subr.mxu1 %v1667_v1 }
  0x3d   : > { %1455 = vmatprep.subr.bf16.mxu0 %v1665_v0 }
  0x3e   : > { %1349 = vmatmul.mubr.f32.vlgmr.msra.gmra.mrb[0].mxu1 %v1876_v50 }
  0x3f   : > { %1314 = vmatmul.mubr.f32.vlgmr.msra.gmra.mrb[0].mxu0 %v1876_v50  ;;  %1388 = vmatprep.mubr.msk.f32.mxu1 %vm1666_vm0, %v1667_v1 }
  0x40   : > { %1383 = vmatprep.mubr.msk.f32.mxu0 %vm1666_vm0, %v1667_v1  ;;  %1457 = vmatpush3.bf16.msra.mxu0 %v1456_v11 }
  0x41   : > { %1458 = vmatprep.subr.bf16.mxu0 %v1665_v0 }
  0x44   : > { %1460 = vmatpush3.bf16.msra.mxu0 %v1459_v13 }
  0x45   : > { %1461 = vmatprep.subr.bf16.mxu0 %v1665_v0 }
  0x48   : > { %1463 = vmatpush3.bf16.msra.mxu0 %v1462_v16 }
  0x49   : > { %1464 = vmatprep.subr.bf16.mxu0 %v1665_v0 }
  0x4c   : > { %1466 = vmatpush3.bf16.msra.mxu0 %v1465_v19 }
  0x4d   : > { %1467 = vmatprep.subr.bf16.mxu0 %v1665_v0 }
  0x50   : > { %1469 = vmatpush3.bf16.msra.mxu0 %v1468_v22 }
  0x51   : > { %1470 = vmatprep.subr.bf16.mxu0 %v1665_v0 }
  0x54   : > { %1472 = vmatpush3.bf16.msra.mxu0 %v1471_v25 }
  0x55   : > { %1473 = vmatprep.subr.bf16.mxu0 %v1665_v0 }
  0x58   : > { %1475 = vmatpush3.bf16.msra.mxu0 %v1474_v28 }
  0x59   : > { %1476 = vmatprep.subr.bf16.mxu0 %v1665_v0 }
  0x5c   : > { %1478 = vmatpush3.bf16.msra.mxu0 %v1477_v31 }
  0x5f   : > { %1384 = vmatmul.mubr.f32.vlgmr.msra.gmra.mrb[2].mxu0 %v1876_v50 }
 0x111   : > { %v666_v53 = vpop.f32.mrb[0].mxu1 }
 0x112   : > { %v667_v54 = vadd.f32 %v1204_v51, %v666_v53  ;;  %v584_v55 = vpop.f32.mrb[0].mxu0  ;;  %v1350_v56 = vpop.f32.mrb[1].mxu1 }
 0x113   : > { %v585_v57 = vadd.f32 %v1203_v52, %v584_v55  ;;  %v1315_v58 = vpop.f32.mrb[1].mxu0 }
 0x114   : > { %v670_v59 = vmul.f32 256.0, %v667_v54 }
 0x115   : > { %v588_v60 = vmul.f32 256.0, %v585_v57 }
 0x116   : > { %v1486_v61 = vround.rtne.f32 %v670_v59  ;;  %v1668_v59 = vmov (!%p1209_p0), 0.0  }
 0x117   : > { %v1485_v62 = vround.rtne.f32 %v588_v60  ;;  %929 = vst [vmem:[#allocation2] sm:$0xff] (!%p1209_p0), %v1668_v59 }
 0x118   : > { %v672_v63 = vmax.f32 %v1486_v61, -32768.0 }
 0x119   : > { %v590_v2 = vmax.f32 %v1485_v62, -32768.0 }
 0x11a   : > { %v673_v3 = vmin.f32 %v672_v63, 32767.0 }
 0x11b   : > { %v591_v4 = vmin.f32 %v590_v2, 32767.0 }
 0x11c   : > { %v674_v5 = vmul.f32 0.00390625, %v673_v3 }
 0x11d   : > { %v592_v6 = vmul.f32 0.00390625, %v591_v4 }
 0x11e   : > { %1387 = vmatpush3.xpose.msk.msra.mxu1 %vm758_vm1, %v674_v5 }
 0x11f   : > { %v757_v7 = vmul.f32 0.17677669, %v592_v6  ;;  %1391 = vmatprep.subr.mxu1 %v1667_v1 }
 0x121   : > { %1389 = vmatmul.mubr.msk.f32.vlgmr.msra.gmra.mrb[2].mxu1 %vm758_vm1, %v757_v7 }
 0x122   : > { %1393 = vmatprep.mubr.msk.f32.mxu1 %vm1666_vm0, %v1667_v1 }
 0x132   : > { %v748_v40 = vpop.f32.mrb[2].mxu0 }
 0x133   : > { %v1385_v42 = vpop.f32.mrb[3].mxu0  ;;  %v749_v43 = vadd.f32 %v1205_v41, %v748_v40 }
 0x135   : > { %v752_v44 = vmul.f32 256.0, %v749_v43 }
 0x137   : > { %v1487_v45 = vround.rtne.f32 %v752_v44 }
 0x139   : > { %v754_v46 = vmax.f32 %v1487_v45, -32768.0 }
 0x13b   : > { %v755_v47 = vmin.f32 %v754_v46, 32767.0 }
 0x13d   : > { %v756_v48 = vmul.f32 0.00390625, %v755_v47 }
 0x13f   : > { %1392 = vmatpush3.msra.mxu1 %v756_v48 }
 0x1f4   : > { %v831_v32 = vpop.f32.mrb[2].mxu1 }
 0x1f5   : > { %v1390_v33 = vpop.f32.mrb[3].mxu1  ;;  %v836_v34 = vsel %vm835_vm2, %v831_v32, -inf }
 0x1f6   : > { %837 = vmax.xlane.f32.xlu0 %v836_v34 }
 0x283   : > { %v838_v35 = vpop.xlane.xlu0 %837 }
 0x284   : > { %v839_v36 = vsub.f32 %v831_v32, %v838_v35 }
 0x286   : > { %v840_v37 = vmul.f32 1.442695, %v839_v36 }
 0x288   : > { %1565 = vpow2.f32 %v840_v37 }
 0x292   : > { %v1566_v38 = vpop.eup %1565 }
 0x293   : > { %v842_v39 = vsel %vm835_vm2, %v1566_v38, 0.0 }
 0x294   : > { %843 = vadd.xlane.f32.xlu0 %v842_v39 }
 0x321   : > { %v844_v49 = vpop.xlane.xlu0 %843 }
 0x322   : > { %1567 = vrcp.f32 %v844_v49 }
 0x32c   : > { %v1568_v50 = vpop.eup %1567 }
 0x32d   : > { %v846_v51 = vmul.f32 %v1568_v50, %v1566_v38 }
 0x32f   : > { %v847_v52 = vmul.f32 256.0, %v846_v51 }
 0x331   : > { %v1488_v53 = vround.rtne.f32 %v847_v52 }
 0x333   : > { %v849_v54 = vmax.f32 %v1488_v53, -32768.0 }
 0x335   : > { %v850_v55 = vmin.f32 %v849_v54, 32767.0 }
 0x337   : > { %v851_v56 = vmul.f32 0.00390625, %v850_v55 }
 0x339   : > { %1394 = vmatmul.mubr.msk.f32.vlgmr.msra.gmra.mrb[4].mxu1 %vm835_vm2, %v851_v56 }
 0x407   : > { %928 = sbr.rel (%p1209_p0) target bundleno = 1038 (0x40e), region = 60 }
 0x40c   : > { %v921_v57 = vpop.f32.mrb[4].mxu1 }
 0x40d   : > { %v1395_v58 = vpop.f32.mrb[5].mxu1 }
 0x40e PF: > { %1479 = vmatprep.subr.bf16.mxu1 %v1665_v0  ;;  %v931_v60 = vld [vmem:[%s1817_s19] sm:$0xff]  ;;  %v932_v61 = vld [vmem:[%s1817_s19 + $0x8] sm:$0xff]  ;;  %v933_v62 = vld [vmem:[%s1817_s19 + $0x10] sm:$0xff]  ;;  %1404 = vmatprep.mubr.msk.f32.mxu1 %vm1666_vm0, %v1667_v1  ;;  %p1211_p1 = scmp.ne.s32.totalorder %s1647_s12, 3 }
 0x40f   : > { %v1480_v63 = vpack.c.bf16 %v932_v61, %v931_v60  ;;  %v934_v2 = vld [vmem:[%s1817_s19 + $0x18] sm:$0xff]  ;;  %v930_v4 = vld [vmem:[#allocation2] sm:$0xff] }
 0x410   : > { %v1483_v3 = vpack.c.bf16 %v934_v2, %v933_v62  ;;  %v1212_v1 = vld [vmem:[%s2016_s8] ss:$0 sm:$0xff] (!%p1211_p1) }
 0x411   : > { %1481 = vmatpush3.bf16.msra.mxu1 %v1480_v63 }
 0x412   : > { %1482 = vmatprep.subr.bf16.mxu1 %v1665_v0 }
 0x415   : > { %1484 = vmatpush3.bf16.msra.mxu1 %v1483_v3 }
 0x418   : > { %1405 = vmatmul.mubr.msk.f32.vlgmr.msra.gmra.mrb[6].mxu1 %vm758_vm1, %v921_v57 }
 0x4e8   : > { %1013 = sbr.rel (%p1211_p1) target bundleno = 1283 (0x503), region = 64 }
 0x4eb   : > { %v1004_v5 = vpop.f32.mrb[6].mxu1 }
 0x4ec   : > { %v1008_v6 = vadd.f32 %v1004_v5, %v930_v4  ;;  %v1406_v7 = vpop.f32.mrb[7].mxu1 }
 0x4ee   : > { %1009 = vst [vmem:[#allocation2] sm:$0xff] %v1008_v6 }
 0x4f5   : > { %v1014_v8 = vld [vmem:[#allocation2] sm:$0xff] }
 0x4f6   : > { %v1022_v9 = vadd.f32 %v1212_v1, %v1014_v8 }
 0x4f8   : > { %v1023_v10 = vmul.f32 256.0, %v1022_v9 }
 0x4fa   : > { %v1489_v0 = vround.rtne.f32 %v1023_v10 }
 0x4fc   : > { %v1025_v11 = vmax.f32 %v1489_v0, -32768.0 }
 0x4fe   : > { %v1026_v12 = vmin.f32 %v1025_v11, 32767.0 }
 0x500   : > { %v1027_v13 = vmul.f32 0.00390625, %v1026_v12 }
 0x502   : > { %1028 = vst [vmem:[%s428_s28] sm:$0xff] %v1027_v13 }
 0x503 PF: > { %s1214_s12 = sshll.u32 %s1651_s13, 7  ;;  %s1043_s20 = sshll.u32 %s428_s28, 4  ;;  %s1044_s20 = int_to_ptr.vmem [resolvable:$true] %s1043_s20 }
 0x504   : > { %s1957_s15 = scalar_lea.hbm %s2017_s9, %s1214_s12  ;;  %s2029_s26 = sand.u32 1, %s1639_s10  }
 0x505   : > { %s1030_s17 = scalar_lea.sflag [#allocation4], %s2029_s26  ;;  %s1569_s29 = scalar_lea.vmem %s1044_s20, 128 }
 0x506   : > { %p1570_p2 = scmp.ne.s32.totalorder %s1044_s20, %s1569_s29  ;;  %s1669_s25 = smov [#allocation3]  }
 0x507   : > { %s1573_s18 = sshll.u32 %s1669_s25, 4  ;;  %s1574_s18 = int_to_ptr.vmem [resolvable:$false] %s1573_s18 }
 0x508   : > { %p1571_p4 = pnand %p1570_p2, %p1769_p3  ;;  %s1575_s23 = scalar_lea.vmem %s1574_s18, 256 }
 0x509   : > { %p1576_p6 = scmp.lt.s32.totalorder %s1044_s20, %s1574_s18  ;;  %p1577_p7 = scmp.lt.s32.totalorder %s1575_s23, %s1569_s29 }
 0x50a   : > { %p1572_p5 = pneg %p1571_p4 }
 0x50b   : > { %p1578_p8 = por %p1577_p7, %p1576_p6 }
 0x50d   : > { %p1579_p10 = pnand %p1578_p8, %p1572_p5 }
 0x50f   : > { %1582 = shalt.err (!%p1579_p10)
}
 0x510   : > { %s1583_s13 = scalar_lea.hbm %s1957_s15, 128  ;;  %s1587_s24 = scalar_lea.hbm %s2017_s9, 256 }
 0x511   : > { %p1584_p11 = scmp.ne.s32.totalorder %s1957_s15, %s1583_s13  ;;  %p1588_p0 = scmp.lt.u32.totalorder %s1957_s15, %s2017_s9 }
 0x512   : > { %p1589_p1 = scmp.lt.u32.totalorder %s1587_s24, %s1583_s13  ;;  %p1591_p4 = scmp.lt.u32.totalorder %s1583_s13, %s1957_s15 }
 0x513   : > { %p1585_p12 = pnand %p1584_p11, %p1769_p3 }
 0x514   : > { %p1590_p2 = por %p1589_p1, %p1588_p0 }
 0x515   : > { %p1586_p13 = pneg %p1585_p12 }
 0x516   : > { %p1592_p5 = por %p1591_p4, %p1590_p2 }
 0x518   : > { %p1593_p6 = pnand %p1592_p5, %p1586_p13 }
 0x51a   : > { %1596 = shalt.err (!%p1593_p6)
}
 0x51b   : > { %1490 = dma.vmem_to_hbm [thread:$0]  (%p1769_p3), %s1044_s20, 128, %s1957_s15, %s1030_s17  }
 0x51c PF: > { %p1496_p7 = scmp.ge.s32.totalorder %s1663_s16, 2  ;;  %s1055_s14 = sand.u32 1, %s1635_s30  }
 0x51d   : > { %s1056_s26 = scalar_lea.sflag [#allocation4], %s1055_s14 }
 0x51e   : > { %p1493_p8 = pnand %p1496_p7, %p1779_p9 }
 0x520   : > { %1630 = dma.done.wait (!%p1493_p8), %s1056_s26, 128  }
 0x521   : > { %1632 = vsyncadd (!%p1493_p8), %s1056_s26, 4294967168  ;;  %s22_s16 = sadd.s32 1, %s1663_s16   ;;  %s2030_s29 = sld [smem:[#allocation10_spill]] }
 0x522   : > { %p19_p10 = scmp.ge.s32.totalorder %s22_s16, 10   ;;  %s2031_s12 = sld [smem:[#allocation6_spill]] }
 0x523   : > { %s2032_s13 = sld [smem:[#allocation7_spill]]  ;;  %s2033_s14 = sld [smem:[#allocation8_spill]] }
 0x524   : > { %s2034_s15 = sld [smem:[#allocation9_spill]]  ;;  %s2035_s30 = smov %s1639_s10 }
 0x525   : > { %s2036_s10 = smov %s1643_s11  ;;  %21 = sbr.rel (!%p19_p10) target bundleno = 5 (0x5), region = 120 }
 0x527   : > { %s2037_s11 = smov %s2030_s29 }
 0x52c   :  { %1061 = vsyncpa [#allocation4], 1 }
 0x52d   :  { %1063 = vsyncpa [#allocation4 + $0x1], 1 }

</bundles_post_ra>
